<compile_context>
chip_gen: v7x
topology: tpu7x:2x2x1
jax: 0.10.0
libtpu: 0.0.40
codegen_flags: <defaults>
</compile_context>

<pallas_src>
import jax
import jax.numpy as jnp
from jax import lax
from jax.experimental import pallas as pl
from jax.experimental.pallas import tpu as pltpu


def _rnn_kernel(x_ref,      # (B, T, I)  VMEM  (torch batch_first layout, untransposed)
                w_ih_ref,   # (H, I)     VMEM  (torch weight_ih_l0, untransposed)
                w_hh_ref,   # (H, H)     VMEM  (torch weight_hh_l0, untransposed)
                b_ih_ref,   # (1, H)     VMEM
                b_hh_ref,   # (1, H)     VMEM
                w_fc_ref,   # (O, H)     VMEM  (torch fc.weight, untransposed)
                b_fc_ref,   # (1, O)     VMEM
                out_ref):   # (B, O)     VMEM
    B, T, I = x_ref.shape
    H = w_hh_ref.shape[0]

    # Loaded / combined once, reused across all timesteps.
    w_hh = w_hh_ref[...]                             # (H, H)
    b_rnn = b_ih_ref[...] + b_hh_ref[...]            # (1, H)

    # ---- Hoisted input projection: one MXU matmul for ALL timesteps -------
    # xw[b*T + t, :] = x[b, t, :] @ W_ih^T + (b_ih + b_hh)
    x2 = x_ref[...].reshape(B * T, I)
    xw = lax.dot_general(
        x2, w_ih_ref[...],
        dimension_numbers=(((1,), (1,)), ((), ())),   # contract I with I (W_ih^T)
        preferred_element_type=jnp.float32) + b_rnn
    xw = xw.reshape(B, T, H)                          # (B, T, H)

    # ---- Fully unrolled recurrence (T is a trace-time constant) -----------
    # per-step critical path: (B,H)@(H,H) MXU matmul + VPU add + EUP tanh.
    h = jnp.tanh(xw[:, 0, :])                         # h0 == 0  =>  h0 @ W_hh == 0
    for t in range(1, T):
        hw = lax.dot_general(
            h, w_hh,
            dimension_numbers=(((1,), (1,)), ((), ())),   # h @ W_hh^T
            preferred_element_type=jnp.float32)
        h = jnp.tanh(xw[:, t, :] + hw)

    # ---- Linear head: out = h_last @ W_fc^T + b_fc -------------------------
    out_ref[...] = (lax.dot_general(
        h, w_fc_ref[...],
        dimension_numbers=(((1,), (1,)), ((), ())),       # h @ W_fc^T
        preferred_element_type=jnp.float32)
        + b_fc_ref[...])


@jax.jit
def rnn_inflation_predictor(x, w_ih, w_hh, b_ih, b_hh, w_fc, b_fc):
    """x: (B, T, I) float32 (PyTorch batch_first).  Returns (B, O) float32."""
    B, T, I = x.shape
    H = w_hh.shape[0]
    O = w_fc.shape[0]

    vmem = pl.BlockSpec(memory_space=pltpu.MemorySpace.VMEM)

    return pl.pallas_call(
        _rnn_kernel,
        out_shape=jax.ShapeDtypeStruct((B, O), jnp.float32),
        in_specs=[vmem] * 7,
        out_specs=vmem,
    )(x.astype(jnp.float32),
      w_ih, w_hh,
      b_ih.reshape(1, H), b_hh.reshape(1, H),
      w_fc, b_fc.reshape(1, O))


def _reference(x, w_ih, w_hh, b_ih, b_hh, w_fc, b_fc):
    """Pure-JAX reference replicating torch nn.RNN(batch_first=True) + Linear."""
    B, T, _ = x.shape
    H = w_hh.shape[0]
    h = jnp.zeros((B, H), jnp.float32)
    for t in range(T):
        h = jnp.tanh(x[:, t, :] @ w_ih.T + b_ih + h @ w_hh.T + b_hh)
    return h @ w_fc.T + b_fc


if __name__ == "__main__":
    # Small shapes consistent with the module (env vars replaced by constants).
    INPUT_SIZE = 4      # input_size
    HIDDEN_SIZE = 32    # hidden_size
    OUTPUT_SIZE = 2     # output_size
    BATCH = 2
    SEQ = 8

    key = jax.random.PRNGKey(0)
    ks = jax.random.split(key, 7)
    bound = 1.0 / jnp.sqrt(HIDDEN_SIZE)  # matches torch RNN/Linear init range

    x = jax.random.normal(ks[0], (BATCH, SEQ, INPUT_SIZE), jnp.float32)
    w_ih = jax.random.uniform(ks[1], (HIDDEN_SIZE, INPUT_SIZE), jnp.float32, -bound, bound)
    w_hh = jax.random.uniform(ks[2], (HIDDEN_SIZE, HIDDEN_SIZE), jnp.float32, -bound, bound)
    b_ih = jax.random.uniform(ks[3], (HIDDEN_SIZE,), jnp.float32, -bound, bound)
    b_hh = jax.random.uniform(ks[4], (HIDDEN_SIZE,), jnp.float32, -bound, bound)
    w_fc = jax.random.uniform(ks[5], (OUTPUT_SIZE, HIDDEN_SIZE), jnp.float32, -bound, bound)
    b_fc = jax.random.uniform(ks[6], (OUTPUT_SIZE,), jnp.float32, -bound, bound)

    out = rnn_inflation_predictor(x, w_ih, w_hh, b_ih, b_hh, w_fc, b_fc)
    out = jax.block_until_ready(out)

    ref = _reference(x, w_ih, w_hh, b_ih, b_hh, w_fc, b_fc)
    assert out.shape == (BATCH, OUTPUT_SIZE)
    assert jnp.allclose(out, ref, atol=1e-5, rtol=1e-5), (out, ref)

    print("KERNEL_OK")
</pallas_src>

<mosaic_0001>
module attributes {stable_mosaic.version = 11 : i64} {
  func.func @_rnn_kernel(%arg0: memref<2x8x4xf32, #tpu.memory_space<vmem>>, %arg1: memref<32x4xf32, #tpu.memory_space<vmem>>, %arg2: memref<32x32xf32, #tpu.memory_space<vmem>>, %arg3: memref<1x32xf32, #tpu.memory_space<vmem>>, %arg4: memref<1x32xf32, #tpu.memory_space<vmem>>, %arg5: memref<2x32xf32, #tpu.memory_space<vmem>>, %arg6: memref<1x2xf32, #tpu.memory_space<vmem>>, %arg7: memref<2x2xf32, #tpu.memory_space<vmem>>) attributes {dimension_semantics = [], scalar_prefetch = 0 : i64, scratch_operands = 0 : i64, tpu.core_type = #tpu.core_type<tc>} {
    %c0 = arith.constant 0 : index
    %c0_0 = arith.constant 0 : index
    %0 = vector.load %arg2[%c0, %c0_0] : memref<32x32xf32, #tpu.memory_space<vmem>>, vector<32x32xf32>
    %c0_1 = arith.constant 0 : index
    %c0_2 = arith.constant 0 : index
    %1 = vector.load %arg3[%c0_1, %c0_2] : memref<1x32xf32, #tpu.memory_space<vmem>>, vector<1x32xf32>
    %c0_3 = arith.constant 0 : index
    %c0_4 = arith.constant 0 : index
    %2 = vector.load %arg4[%c0_3, %c0_4] : memref<1x32xf32, #tpu.memory_space<vmem>>, vector<1x32xf32>
    %3 = arith.addf %1, %2 : vector<1x32xf32>
    %c0_5 = arith.constant 0 : index
    %c0_6 = arith.constant 0 : index
    %c0_7 = arith.constant 0 : index
    %4 = vector.load %arg0[%c0_5, %c0_6, %c0_7] : memref<2x8x4xf32, #tpu.memory_space<vmem>>, vector<2x8x4xf32>
    %5 = vector.shape_cast %4 : vector<2x8x4xf32> to vector<16x4xf32>
    %c0_8 = arith.constant 0 : index
    %c0_9 = arith.constant 0 : index
    %6 = vector.load %arg1[%c0_8, %c0_9] : memref<32x4xf32, #tpu.memory_space<vmem>>, vector<32x4xf32>
    %cst = arith.constant dense<0.000000e+00> : vector<16x32xf32>
    %7 = tpu.matmul %5, %6, %cst {dimension_numbers = #tpu.dot_dimension_numbers<[1], [1], [0], [0], [0, 0, 1, 0], [], []>} : vector<16x4xf32>, vector<32x4xf32>, vector<16x32xf32> -> vector<16x32xf32>
    %8 = vector.broadcast %3 : vector<1x32xf32> to vector<16x32xf32>
    %9 = arith.addf %7, %8 : vector<16x32xf32>
    %10 = vector.shape_cast %9 : vector<16x32xf32> to vector<2x8x32xf32>
    %11 = vector.extract_strided_slice %10 {offsets = [0, 0, 0], sizes = [2, 1, 32], strides = [1, 1, 1]} : vector<2x8x32xf32> to vector<2x1x32xf32>
    %12 = vector.shape_cast %11 : vector<2x1x32xf32> to vector<2x32xf32>
    %13 = math.tanh %12 : vector<2x32xf32>
    %cst_10 = arith.constant dense<0.000000e+00> : vector<2x32xf32>
    %14 = tpu.matmul %13, %0, %cst_10 {dimension_numbers = #tpu.dot_dimension_numbers<[1], [1], [0], [0], [0, 0, 1, 0], [], []>} : vector<2x32xf32>, vector<32x32xf32>, vector<2x32xf32> -> vector<2x32xf32>
    %15 = vector.extract_strided_slice %10 {offsets = [0, 1, 0], sizes = [2, 1, 32], strides = [1, 1, 1]} : vector<2x8x32xf32> to vector<2x1x32xf32>
    %16 = vector.shape_cast %15 : vector<2x1x32xf32> to vector<2x32xf32>
    %17 = arith.addf %16, %14 : vector<2x32xf32>
    %18 = math.tanh %17 : vector<2x32xf32>
    %cst_11 = arith.constant dense<0.000000e+00> : vector<2x32xf32>
    %19 = tpu.matmul %18, %0, %cst_11 {dimension_numbers = #tpu.dot_dimension_numbers<[1], [1], [0], [0], [0, 0, 1, 0], [], []>} : vector<2x32xf32>, vector<32x32xf32>, vector<2x32xf32> -> vector<2x32xf32>
    %20 = vector.extract_strided_slice %10 {offsets = [0, 2, 0], sizes = [2, 1, 32], strides = [1, 1, 1]} : vector<2x8x32xf32> to vector<2x1x32xf32>
    %21 = vector.shape_cast %20 : vector<2x1x32xf32> to vector<2x32xf32>
    %22 = arith.addf %21, %19 : vector<2x32xf32>
    %23 = math.tanh %22 : vector<2x32xf32>
    %cst_12 = arith.constant dense<0.000000e+00> : vector<2x32xf32>
    %24 = tpu.matmul %23, %0, %cst_12 {dimension_numbers = #tpu.dot_dimension_numbers<[1], [1], [0], [0], [0, 0, 1, 0], [], []>} : vector<2x32xf32>, vector<32x32xf32>, vector<2x32xf32> -> vector<2x32xf32>
    %25 = vector.extract_strided_slice %10 {offsets = [0, 3, 0], sizes = [2, 1, 32], strides = [1, 1, 1]} : vector<2x8x32xf32> to vector<2x1x32xf32>
    %26 = vector.shape_cast %25 : vector<2x1x32xf32> to vector<2x32xf32>
    %27 = arith.addf %26, %24 : vector<2x32xf32>
    %28 = math.tanh %27 : vector<2x32xf32>
    %cst_13 = arith.constant dense<0.000000e+00> : vector<2x32xf32>
    %29 = tpu.matmul %28, %0, %cst_13 {dimension_numbers = #tpu.dot_dimension_numbers<[1], [1], [0], [0], [0, 0, 1, 0], [], []>} : vector<2x32xf32>, vector<32x32xf32>, vector<2x32xf32> -> vector<2x32xf32>
    %30 = vector.extract_strided_slice %10 {offsets = [0, 4, 0], sizes = [2, 1, 32], strides = [1, 1, 1]} : vector<2x8x32xf32> to vector<2x1x32xf32>
    %31 = vector.shape_cast %30 : vector<2x1x32xf32> to vector<2x32xf32>
    %32 = arith.addf %31, %29 : vector<2x32xf32>
    %33 = math.tanh %32 : vector<2x32xf32>
    %cst_14 = arith.constant dense<0.000000e+00> : vector<2x32xf32>
    %34 = tpu.matmul %33, %0, %cst_14 {dimension_numbers = #tpu.dot_dimension_numbers<[1], [1], [0], [0], [0, 0, 1, 0], [], []>} : vector<2x32xf32>, vector<32x32xf32>, vector<2x32xf32> -> vector<2x32xf32>
    %35 = vector.extract_strided_slice %10 {offsets = [0, 5, 0], sizes = [2, 1, 32], strides = [1, 1, 1]} : vector<2x8x32xf32> to vector<2x1x32xf32>
    %36 = vector.shape_cast %35 : vector<2x1x32xf32> to vector<2x32xf32>
    %37 = arith.addf %36, %34 : vector<2x32xf32>
    %38 = math.tanh %37 : vector<2x32xf32>
    %cst_15 = arith.constant dense<0.000000e+00> : vector<2x32xf32>
    %39 = tpu.matmul %38, %0, %cst_15 {dimension_numbers = #tpu.dot_dimension_numbers<[1], [1], [0], [0], [0, 0, 1, 0], [], []>} : vector<2x32xf32>, vector<32x32xf32>, vector<2x32xf32> -> vector<2x32xf32>
    %40 = vector.extract_strided_slice %10 {offsets = [0, 6, 0], sizes = [2, 1, 32], strides = [1, 1, 1]} : vector<2x8x32xf32> to vector<2x1x32xf32>
    %41 = vector.shape_cast %40 : vector<2x1x32xf32> to vector<2x32xf32>
    %42 = arith.addf %41, %39 : vector<2x32xf32>
    %43 = math.tanh %42 : vector<2x32xf32>
    %cst_16 = arith.constant dense<0.000000e+00> : vector<2x32xf32>
    %44 = tpu.matmul %43, %0, %cst_16 {dimension_numbers = #tpu.dot_dimension_numbers<[1], [1], [0], [0], [0, 0, 1, 0], [], []>} : vector<2x32xf32>, vector<32x32xf32>, vector<2x32xf32> -> vector<2x32xf32>
    %45 = vector.extract_strided_slice %10 {offsets = [0, 7, 0], sizes = [2, 1, 32], strides = [1, 1, 1]} : vector<2x8x32xf32> to vector<2x1x32xf32>
    %46 = vector.shape_cast %45 : vector<2x1x32xf32> to vector<2x32xf32>
    %47 = arith.addf %46, %44 : vector<2x32xf32>
    %48 = math.tanh %47 : vector<2x32xf32>
    %c0_17 = arith.constant 0 : index
    %c0_18 = arith.constant 0 : index
    %49 = vector.load %arg5[%c0_17, %c0_18] : memref<2x32xf32, #tpu.memory_space<vmem>>, vector<2x32xf32>
    %cst_19 = arith.constant dense<0.000000e+00> : vector<2x2xf32>
    %50 = tpu.matmul %48, %49, %cst_19 {dimension_numbers = #tpu.dot_dimension_numbers<[1], [1], [0], [0], [0, 0, 1, 0], [], []>} : vector<2x32xf32>, vector<2x32xf32>, vector<2x2xf32> -> vector<2x2xf32>
    %c0_20 = arith.constant 0 : index
    %c0_21 = arith.constant 0 : index
    %51 = vector.load %arg6[%c0_20, %c0_21] : memref<1x2xf32, #tpu.memory_space<vmem>>, vector<1x2xf32>
    %52 = vector.broadcast %51 : vector<1x2xf32> to vector<2x2xf32>
    %53 = arith.addf %50, %52 : vector<2x2xf32>
    %c0_22 = arith.constant 0 : index
    %c0_23 = arith.constant 0 : index
    %54 = vector.load %arg7[%c0_22, %c0_23] : memref<2x2xf32, #tpu.memory_space<vmem>>, vector<2x2xf32>
    tpu.vector_store %arg7[%c0_22, %c0_23], %53 {strides = array<i32>} : memref<2x2xf32, #tpu.memory_space<vmem>>, vector<2x2xf32>,
    return
  }
}

</mosaic_0001>

<bundles_post_ra>
// kernel: rnn_inflation_predictor.1
= control target key start
LH: loop header
LB: loop body
LE: loop exit
PB: predicated region body
PF: predicated region fallthrough
CT: control target
= control target key end

     0   :  { %vm46_vm0 = vcmask 31744   ;;  %s1385_s0 = inlined_call_operand.vmem [shape: f32[2,8,4], index: 0, kind: input, shape index: {}]   ;;  %s1386_s1 = inlined_call_operand.vmem [shape: f32[32,4], index: 1, kind: input, shape index: {}]   ;;  %s1387_s2 = inlined_call_operand.vmem [shape: f32[32,32], index: 2, kind: input, shape index: {}]   ;;  %s1388_s3 = inlined_call_operand.vmem [shape: f32[1,32], index: 3, kind: input, shape index: {}]   ;;  %s1389_s4 = inlined_call_operand.vmem [shape: f32[1,32], index: 4, kind: input, shape index: {}]   ;;  %s1390_s5 = inlined_call_operand.vmem [shape: f32[2,32], index: 5, kind: input, shape index: {}]   ;;  %s1391_s6 = inlined_call_operand.vmem [shape: f32[1,2], index: 6, kind: input, shape index: {}]   ;;  %s1392_s7 = inlined_call_operand.hbm [shape: f32[2,2], index: 7, kind: output, shape index: {}]  }
   0x1   :  { %v36_v0 = vld [vmem:[%s1386_s1] sm:$0xff]  ;;  %v37_v1 = vld [vmem:[%s1386_s1 + $0x8] sm:$0xff]  ;;  %v38_v2 = vld [vmem:[%s1386_s1 + $0x10] sm:$0xff] }
   0x2   :  { %v1039_v3 = vpack.c.bf16 %v37_v1, %v36_v0  ;;  %vm1040_vm1 = vmpackc.low %vm46_vm0, %vm46_vm0  ;;  %v39_v4 = vld [vmem:[%s1386_s1 + $0x18] sm:$0xff]  ;;  %v34_v5 = vld [vmem:[%s1385_s0] sm:$0xff] }
   0x3   :  { %v1045_v6 = vpack.c.bf16 %v39_v4, %v38_v2  ;;  %954 = vmatprep.mubr.msk.f32.mxu0 %vm46_vm0, %v34_v5 }
   0x4   :  { %1041 = vmatprep.subr.msk.bf16.mxu0 %vm1040_vm1, %v1039_v3 }
   0x5   :  { %12 = vsyncpa [#allocation3], 0  ;;  %1044 = vmatpush3.bf16.xpose.msk.msra.mxu0 %vm1040_vm1, %v1039_v3  ;;  %v35_v7 = vld [vmem:[%s1385_s0 + $0x8] sm:$0xff]  ;;  %v27_v8 = vld [vmem:[%s1387_s2] sm:$0xff]  ;;  %vm147_vm2 = vcmask 261120   ;;  %v1167_v11 = vmov 0.0|0.0   ;;  %v41_v17 = vlaneseq }
   0x6   :  { %1047 = vmatprep.subr.msk.bf16.mxu0 %vm1040_vm1, %v1045_v6  ;;  %v28_v9 = vld [vmem:[%s1387_s2 + $0x8] sm:$0xff]  ;;  %1051 = vmatprep.subr.bf16.mxu1 %v1167_v11  ;;  %vm1240_vm3 = vmpackc.low %vm147_vm2, %vm147_vm2  ;;  %v29_v13 = vld [vmem:[%s1387_s2 + $0x10] sm:$0xff]  ;;  %vm1168_vm4 = vmmov 0   ;;  %v1169_v15 = vmov 0.0   ;;  %vm145_vm5 = vcmask 1041409   ;;  %s1170_s23 = smov [#allocation2]  }
   0x7   :  { %v1235_v10 = vpack.c.bf16 %v28_v9, %v27_v8  ;;  %v30_v14 = vld [vmem:[%s1387_s2 + $0x18] sm:$0xff]  ;;  %965 = vmatprep.mubr.msk.f32.mxu1 %vm1168_vm4, %v1169_v15  ;;  %v42_v18 = vshrl.u32 %v41_v17, 7  ;;  %v31_v19 = vld [vmem:[%s1388_s3] sm:$0x1]  ;;  %s851_s24 = sshll.u32 %s1170_s23, 4  ;;  %vm843_vm6 = vcmask 9216   ;;  %s852_s24 = int_to_ptr.vmem [resolvable:$true] %s851_s24 }
   0x8   :  { %v1263_v16 = vpack.c.bf16 %v30_v14, %v29_v13  ;;  %v32_v20 = vld [vmem:[%s1389_s4] sm:$0x1]  ;;  %s1143_s25 = scalar_lea.vmem %s852_s24, 32  ;;  %p1148_p1 = scmp.lt.s32.totalorder %s852_s24, %s852_s24 }
   0x9   :  { %1054 = vmatpush3.bf16.xpose.msk.msra.mxu1 %vm1240_vm3, %v1235_v10  ;;  %v33_v21 = vadd.f32 %v32_v20, %v31_v19  ;;  %v43_v22 = vsub.s32 0, %v42_v18  ;;  %p1144_p0 = scmp.ne.s32.totalorder %s852_s24, %s1143_s25  ;;  %p1149_p2 = scmp.lt.s32.totalorder %s1143_s25, %s1143_s25 }
   0xa   :  { %1055 = vmatprep.subr.bf16.mxu1 %v1167_v11 }
   0xb   :  { %v44_v23 = vrot.slane %v33_v21, %v43_v22  ;;  %p1150_p3 = por %p1149_p2, %p1148_p1 }
   0xd   :  { %1050 = vmatpush3.bf16.xpose.msk.msra.mxu0 %vm1040_vm1, %v1045_v6  ;;  %p1151_p4 = pnand %p1150_p3, %p1144_p0 }
   0xe   :  { %1059 = vmatprep.subr.bf16.mxu0 %v1167_v11 }
  0x11   :  { %1058 = vmatpush3.bf16.xpose.msk.msra.mxu1 %vm1240_vm3, %v1263_v16 }
  0x12   :  { %1067 = vmatprep.subr.bf16.mxu1 %v1167_v11 }
  0x14   :  { %955 = vmatmul.mubr.msk.f32.vlgmr.msra.gmra.mrb[0].mxu0 %vm46_vm0, %v35_v7 }
  0x15   :  { %1062 = vmatpush3.bf16.xpose.msk.msra.mxu0 %vm1240_vm3, %v1235_v10  ;;  %976 = vmatprep.mubr.msk.f32.mxu0 %vm1168_vm4, %v1169_v15 }
  0x16   :  { %1063 = vmatprep.subr.bf16.mxu0 %v1167_v11 }
  0x1d   :  { %1066 = vmatpush3.bf16.xpose.msk.msra.mxu0 %vm1240_vm3, %v1263_v16 }
  0x1e   :  { %1075 = vmatprep.subr.bf16.mxu0 %v1167_v11 }
  0xe7   :  { %v956_v24 = vpop.f32.mrb[0].mxu0 }
  0xe8   :  { %v1279_v25 = vadd.f32 %v956_v24, %v44_v23  ;;  %v131_v26 = vpop.f32.mrb[1].mxu0 }
  0xe9   :  { %v1281_v27 = vadd.f32 %v131_v26, %v44_v23 }
  0xea   :  { %1111 = vtanh.f32 %v1279_v25 }
  0xeb   :  { %1113 = vtanh.f32 %v1281_v27 }
  0xf4   :  { %v1112_v28 = vpop.eup %1111 }
  0xf5   :  { %v1114_v29 = vpop.eup %1113  ;;  %v144_v30 = vrot.slane %v1112_v28, 7 }
  0xf7   :  { %v146_v31 = vsel %vm145_vm5, %v144_v30, %v1114_v29 }
  0xf8   :  { %966 = vmatmul.mubr.msk.f32.vlgmr.msra.gmra.mrb[0].mxu1 %vm147_vm2, %v146_v31 }
  0xf9   :  { %1070 = vmatpush3.bf16.xpose.msk.msra.mxu1 %vm1240_vm3, %v1235_v10  ;;  %987 = vmatprep.mubr.msk.f32.mxu1 %vm1168_vm4, %v1169_v15 }
  0xfa   :  { %1071 = vmatprep.subr.bf16.mxu1 %v1167_v11 }
 0x101   :  { %1074 = vmatpush3.bf16.xpose.msk.msra.mxu1 %vm1240_vm3, %v1263_v16 }
 0x102   :  { %1083 = vmatprep.subr.bf16.mxu1 %v1167_v11 }
 0x1cb   :  { %v228_v32 = vpop.f32.mrb[0].mxu1 }
 0x1cc   :  { %v233_v33 = vrot.slane %v228_v32, 7  ;;  %v967_v34 = vpop.f32.mrb[1].mxu1  ;;  %v237_v36 = vadd.f32 %v228_v32, %v1279_v25 }
 0x1ce   :  { %v236_v35 = vadd.f32 %v233_v33, %v1281_v27 }
 0x1d0   :  { %1115 = vtanh.f32 %v236_v35 }
 0x1d1   :  { %1117 = vtanh.f32 %v237_v36 }
 0x1da   :  { %v1116_v37 = vpop.eup %1115 }
 0x1db   :  { %v242_v38 = vrot.slane %v1116_v37, 1  ;;  %v1118_v39 = vpop.eup %1117 }
 0x1dd   :  { %v243_v40 = vsel %vm145_vm5, %v1118_v39, %v242_v38 }
 0x1de   :  { %977 = vmatmul.mubr.msk.f32.vlgmr.msra.gmra.mrb[2].mxu0 %vm147_vm2, %v243_v40 }
 0x1df   :  { %1078 = vmatpush3.bf16.xpose.msk.msra.mxu0 %vm1240_vm3, %v1235_v10  ;;  %998 = vmatprep.mubr.msk.f32.mxu0 %vm1168_vm4, %v1169_v15 }
 0x1e0   :  { %1079 = vmatprep.subr.bf16.mxu0 %v1167_v11 }
 0x1e7   :  { %1082 = vmatpush3.bf16.xpose.msk.msra.mxu0 %vm1240_vm3, %v1263_v16 }
 0x1e8   :  { %1091 = vmatprep.subr.bf16.mxu0 %v1167_v11 }
 0x2b1   :  { %v312_v41 = vpop.f32.mrb[2].mxu0 }
 0x2b2   :  { %v317_v42 = vrot.slane %v312_v41, 6  ;;  %v318_v43 = vrot.slane %v312_v41, 7  ;;  %v978_v44 = vpop.f32.mrb[3].mxu0 }
 0x2b4   :  { %v321_v45 = vadd.f32 %v317_v42, %v1281_v27  ;;  %v322_v46 = vadd.f32 %v318_v43, %v1279_v25 }
 0x2b6   :  { %1119 = vtanh.f32 %v321_v45 }
 0x2b7   :  { %1121 = vtanh.f32 %v322_v46  ;;  %v900_v46 = vld [vmem:[%s1391_s6] ss:$0 sm:$0xff] }
 0x2c0   :  { %v1120_v47 = vpop.eup %1119 }
 0x2c1   :  { %v1122_v48 = vpop.eup %1121  ;;  %v327_v49 = vrot.slane %v1120_v47, 2 }
 0x2c2   :  { %v328_v50 = vrot.slane %v1122_v48, 1 }
 0x2c4   :  { %v329_v51 = vsel %vm145_vm5, %v328_v50, %v327_v49 }
 0x2c5   :  { %988 = vmatmul.mubr.msk.f32.vlgmr.msra.gmra.mrb[2].mxu1 %vm147_vm2, %v329_v51 }
 0x2c6   :  { %1086 = vmatpush3.bf16.xpose.msk.msra.mxu1 %vm1240_vm3, %v1235_v10  ;;  %1009 = vmatprep.mubr.msk.f32.mxu1 %vm1168_vm4, %v1169_v15 }
 0x2c7   :  { %1087 = vmatprep.subr.bf16.mxu1 %v1167_v11 }
 0x2ce   :  { %1090 = vmatpush3.bf16.xpose.msk.msra.mxu1 %vm1240_vm3, %v1263_v16 }
 0x2cf   :  { %1099 = vmatprep.subr.bf16.mxu1 %v1167_v11 }
 0x398   :  { %v398_v52 = vpop.f32.mrb[2].mxu1 }
 0x399   :  { %v403_v53 = vrot.slane %v398_v52, 5  ;;  %v404_v54 = vrot.slane %v398_v52, 6  ;;  %v989_v55 = vpop.f32.mrb[3].mxu1 }
 0x39b   :  { %v407_v56 = vadd.f32 %v403_v53, %v1281_v27  ;;  %v408_v57 = vadd.f32 %v404_v54, %v1279_v25 }
 0x39d   :  { %1123 = vtanh.f32 %v407_v56 }
 0x39e   :  { %1125 = vtanh.f32 %v408_v57 }
 0x3a7   :  { %v1124_v58 = vpop.eup %1123 }
 0x3a8   :  { %v1126_v59 = vpop.eup %1125  ;;  %v413_v60 = vrot.slane %v1124_v58, 3 }
 0x3a9   :  { %v414_v61 = vrot.slane %v1126_v59, 2 }
 0x3ab   :  { %v415_v62 = vsel %vm145_vm5, %v414_v61, %v413_v60 }
 0x3ac   :  { %999 = vmatmul.mubr.msk.f32.vlgmr.msra.gmra.mrb[4].mxu0 %vm147_vm2, %v415_v62 }
 0x3ad   :  { %1094 = vmatpush3.bf16.xpose.msk.msra.mxu0 %vm1240_vm3, %v1235_v10  ;;  %1020 = vmatprep.mubr.msk.f32.mxu0 %vm1168_vm4, %v1169_v15 }
 0x3ae   :  { %1095 = vmatprep.subr.bf16.mxu0 %v1167_v11 }
 0x3b5   :  { %1098 = vmatpush3.bf16.xpose.msk.msra.mxu0 %vm1240_vm3, %v1263_v16 }
 0x3b6   :  { %1034 = vmatprep.subr.mxu0 %v1169_v15 }
 0x47f   :  { %v484_v63 = vpop.f32.mrb[4].mxu0 }
 0x480   :  { %v489_v0 = vrot.slane %v484_v63, 4  ;;  %v490_v1 = vrot.slane %v484_v63, 5  ;;  %v1000_v2 = vpop.f32.mrb[5].mxu0 }
 0x482   :  { %v493_v3 = vadd.f32 %v489_v0, %v1281_v27  ;;  %v494_v4 = vadd.f32 %v490_v1, %v1279_v25 }
 0x484   :  { %1127 = vtanh.f32 %v493_v3 }
 0x485   :  { %1129 = vtanh.f32 %v494_v4 }
 0x48e   :  { %v1128_v5 = vpop.eup %1127 }
 0x48f   :  { %v1130_v6 = vpop.eup %1129  ;;  %v499_v7 = vrot.slane %v1128_v5, 4 }
 0x490   :  { %v500_v8 = vrot.slane %v1130_v6, 3 }
 0x492   :  { %v501_v9 = vsel %vm145_vm5, %v500_v8, %v499_v7 }
 0x493   :  { %1010 = vmatmul.mubr.msk.f32.vlgmr.msra.gmra.mrb[4].mxu1 %vm147_vm2, %v501_v9 }
 0x494   :  { %1102 = vmatpush3.bf16.xpose.msk.msra.mxu1 %vm1240_vm3, %v1235_v10  ;;  %1031 = vmatprep.mubr.msk.f32.mxu1 %vm1168_vm4, %v1169_v15 }
 0x495   :  { %1103 = vmatprep.subr.bf16.mxu1 %v1167_v11 }
 0x49c   :  { %1106 = vmatpush3.bf16.xpose.msk.msra.mxu1 %vm1240_vm3, %v1263_v16 }
 0x566   :  { %v570_v13 = vpop.f32.mrb[4].mxu1 }
 0x567   :  { %v575_v14 = vrot.slane %v570_v13, 3  ;;  %v576_v17 = vrot.slane %v570_v13, 4  ;;  %v1011_v18 = vpop.f32.mrb[5].mxu1 }
 0x569   :  { %v579_v19 = vadd.f32 %v575_v14, %v1281_v27  ;;  %v580_v20 = vadd.f32 %v576_v17, %v1279_v25 }
 0x56b   :  { %1131 = vtanh.f32 %v579_v19 }
 0x56c   :  { %1133 = vtanh.f32 %v580_v20 }
 0x575   :  { %v1132_v10 = vpop.eup %1131 }
 0x576   :  { %v1134_v21 = vpop.eup %1133  ;;  %v585_v22 = vrot.slane %v1132_v10, 5 }
 0x577   :  { %v586_v23 = vrot.slane %v1134_v21, 4 }
 0x579   :  { %v587_v11 = vsel %vm145_vm5, %v586_v23, %v585_v22 }
 0x57a   :  { %1021 = vmatmul.mubr.msk.f32.vlgmr.msra.gmra.mrb[6].mxu0 %vm147_vm2, %v587_v11 }
 0x57b   :  { %1036 = vmatprep.mubr.msk.f32.mxu0 %vm1168_vm4, %v1169_v15  ;;  %v755_v15 = vld [vmem:[%s1390_s5] sm:$0x3] }
 0x57c   :  { %1035 = vmatpush3.xpose.msk.msra.mxu0 %vm147_vm2, %v755_v15 }
 0x64d   :  { %v656_v12 = vpop.f32.mrb[6].mxu0 }
 0x64e   :  { %v661_v16 = vrot.slane %v656_v12, 2  ;;  %v662_v24 = vrot.slane %v656_v12, 3  ;;  %v1022_v26 = vpop.f32.mrb[7].mxu0 }
 0x650   :  { %v665_v28 = vadd.f32 %v661_v16, %v1281_v27  ;;  %v666_v29 = vadd.f32 %v662_v24, %v1279_v25 }
 0x652   :  { %1135 = vtanh.f32 %v665_v28 }
 0x653   :  { %1137 = vtanh.f32 %v666_v29 }
 0x65c   :  { %v1136_v30 = vpop.eup %1135 }
 0x65d   :  { %v1138_v31 = vpop.eup %1137  ;;  %v671_v32 = vrot.slane %v1136_v30, 6 }
 0x65e   :  { %v672_v33 = vrot.slane %v1138_v31, 5 }
 0x660   :  { %v673_v34 = vsel %vm145_vm5, %v672_v33, %v671_v32 }
 0x661   :  { %1032 = vmatmul.mubr.msk.f32.vlgmr.msra.gmra.mrb[6].mxu1 %vm147_vm2, %v673_v34 }
 0x734   :  { %v742_v35 = vpop.f32.mrb[6].mxu1 }
 0x735   :  { %v747_v36 = vrot.slane %v742_v35, 1  ;;  %v748_v37 = vrot.slane %v742_v35, 2  ;;  %v1033_v38 = vpop.f32.mrb[7].mxu1 }
 0x737   :  { %v751_v39 = vadd.f32 %v747_v36, %v1281_v27  ;;  %v752_v40 = vadd.f32 %v748_v37, %v1279_v25 }
 0x739   :  { %1139 = vtanh.f32 %v751_v39 }
 0x73a   :  { %1141 = vtanh.f32 %v752_v40 }
 0x743   :  { %v1140_v41 = vpop.eup %1139 }
 0x744   :  { %v1142_v42 = vpop.eup %1141  ;;  %v765_v43 = vrot.slane %v1140_v41, 7 }
 0x745   :  { %v766_v44 = vrot.slane %v1142_v42, 6 }
 0x747   :  { %v767_v45 = vsel %vm145_vm5, %v766_v44, %v765_v43 }
 0x748   :  { %1037 = vmatmul.mubr.msk.f32.vlgmr.msra.gmra.mrb[8].mxu0 %vm147_vm2, %v767_v45 }
 0x81b   :  { %v839_v47 = vpop.f32.mrb[8].mxu0 }
 0x81c   :  { %v840_v27 = vadd.f32 %v900_v46, %v839_v47  ;;  %v1038_v25 = vpop.f32.mrb[9].mxu0 }
 0x81e   :  { %844 = vst.msk [vmem:[#allocation2] sm:$0x3] %vm843_vm6, %v840_v27 }
 0x81f   :  { %1154 = shalt.err (!%p1151_p4)
}
 0x820   :  { %s1155_s28 = scalar_lea.hbm %s1392_s7, 32 }
 0x821   :  { %p1156_p5 = scmp.ne.s32.totalorder %s1392_s7, %s1155_s28  ;;  %p1159_p6 = scmp.lt.u32.totalorder %s1155_s28, %s1392_s7 }
 0x823   :  { %p1161_p7 = pnand %p1159_p6, %p1156_p5 }
 0x825   :  { %1164 = shalt.err (!%p1161_p7)
}
 0x826   :  { %854 = dma.vmem_to_hbm [thread:$0]  %s852_s24, 32, %s1392_s7, [#allocation3]  }
 0x827   :  { %1165 = dma.done.wait [#allocation3], 32  }
 0x828   :  { %1166 = vsyncadd [#allocation3], 4294967264 }
 0x829   :  { %858 = vsyncpa [#allocation3], 1 }

</bundles_post_ra>
